<compile_context>
chip_gen: v5e
topology: v5e:2x2
jax: 0.10.0
libtpu: 0.0.40
codegen_flags: <defaults>
</compile_context>

<pallas_src>
import math

import jax
import jax.numpy as jnp
from jax.experimental import pallas as pl
from jax.experimental.pallas import tpu as pltpu


# ----------------------------------------------------------------------------
# "init": build the sinusoidal PE buffer, mirroring the PyTorch __init__.
# ----------------------------------------------------------------------------
def make_pe(d_model, max_shape=(256, 256), temp_bug_fix=True, dtype=jnp.float32):
    assert d_model % 4 == 0, "d_model must be divisible by 4"
    H, W = max_shape
    y_position = jnp.cumsum(jnp.ones((H, W), dtype=dtype), axis=0)[None]  # (1,H,W)
    x_position = jnp.cumsum(jnp.ones((H, W), dtype=dtype), axis=1)[None]  # (1,H,W)
    ar = jnp.arange(0, d_model // 2, 2, dtype=dtype)
    if temp_bug_fix:
        div_term = jnp.exp(ar * (-math.log(10000.0) / (d_model // 2)))
    else:
        # parity with the PyTorch operator-precedence bug: (-log(1e4) / d_model) // 2
        div_term = jnp.exp(ar * (-math.log(10000.0) / d_model // 2))
    div_term = div_term[:, None, None]  # (d_model//4, 1, 1)

    pe = jnp.zeros((d_model, H, W), dtype=dtype)
    pe = pe.at[0::4, :, :].set(jnp.sin(x_position * div_term))
    pe = pe.at[1::4, :, :].set(jnp.cos(x_position * div_term))
    pe = pe.at[2::4, :, :].set(jnp.sin(y_position * div_term))
    pe = pe.at[3::4, :, :].set(jnp.cos(y_position * div_term))
    return pe[None]  # (1, d_model, H, W)


def prepare_pe(pe, H, W, dtype):
    """Slice the raw (1, C, Hmax, Wmax) buffer to (H, W), cast to the
    activation dtype and flatten to a lane-dense (1, C, H*W) view.

    Call ONCE per (H, W, dtype) at init / setup time.  Doing this per forward
    call adds a separate XLA copy (read f32 PE + write casted copy) that can
    double the end-to-end HBM traffic of the kernel.
    """
    _, C, Hm, Wm = pe.shape
    assert Hm >= H and Wm >= W
    return pe[:, :, :H, :W].astype(dtype).reshape(1, C, H * W)


# ----------------------------------------------------------------------------
# Pallas kernel: lane-dense elementwise add of one (Ct, HWt) tile.
# ----------------------------------------------------------------------------
def _add_pe_kernel(x_ref, pe_ref, o_ref):
    # astype is a no-op when pe was prepared with prepare_pe(); otherwise the
    # cast runs on the VPU (free under a memory-bound roofline) instead of as
    # a separate XLA copy in HBM.
    o_ref[...] = x_ref[...] + pe_ref[...].astype(x_ref.dtype)


def _pick_tiles(C, HW, itemsize, n_batch, target_bytes=4 << 20):
    """Pick (C_tile, HW_tile): lane-dense blocks of ~target_bytes each."""
    # Sublane-packing multiple: 8 rows for f32, 16 for bf16, 32 for int8/fp8.
    sub = max(8, 32 // max(1, itemsize))

    # Lane (last) dim: full contiguous row whenever one sublane-pack of rows
    # fits the budget (single contiguous DMA slab, fewer grid steps);
    # otherwise a big multiple of 128 (cap 8192 lanes).
    if HW < 128 or sub * HW * itemsize <= target_bytes:
        hw_t = HW  # block dim == full array dim -> always layout-legal
    else:
        hw_t = max(128, min((HW // 128) * 128, 8192))

    # Sublane (C) dim: fill the per-block byte budget, multiple of `sub` when
    # tiled (a block dim equal to the full array dim is always legal).
    c_budget = max(1, target_bytes // max(1, hw_t * itemsize))
    if c_budget >= C or C <= sub:
        c_t = C
    else:
        c_t = max(sub, (min(c_budget, C) // sub) * sub)

    # v7x has 2 TensorCores per chip: avoid a degenerate single-step grid when
    # N == 1 and the work is non-trivial, so both cores get a tile.
    total_bytes = C * HW * itemsize
    if n_batch == 1 and c_t >= C and hw_t >= HW and total_bytes >= (512 << 10):
        if C >= 2 * sub:
            c_t = max(sub, ((C + 1) // 2 // sub) * sub)
        elif HW >= 2 * 128:
            hw_t = max(128, ((HW + 1) // 2 // 128) * 128)
    return c_t, hw_t


def position_encoding_sine(x, pe, *, donate_x=False):
    """x: (N, C, H, W).

    pe: either the prepared (1, C, H*W) buffer from prepare_pe() (preferred,
    hot path), or the raw (1, C, Hmax, Wmax) buffer (sliced/cast here).

    Returns x + pe[:, :, :H, :W] (broadcast over N), same dtype as x.
    """
    N, C, H, W = x.shape
    HW = H * W

    if pe.ndim == 4:
        # Convenience path: slice/cast/flatten per call.  For production, do
        # this once at init via prepare_pe() and pass the 3-D buffer.
        pe2 = prepare_pe(pe, H, W, x.dtype)
    else:
        pe2 = pe
    assert pe2.shape == (1, C, HW), (pe2.shape, (1, C, HW))

    x2 = x.reshape(N, C, HW)  # lane-dense: big spatial dim last

    c_t, hw_t = _pick_tiles(C, HW, jnp.dtype(x.dtype).itemsize, N)

    # N innermost (fastest-varying): pe's block index (0, c, s) is unchanged
    # across consecutive steps, so Pallas fetches each pe tile exactly once
    # per (c, s) instead of once per (n, c, s).
    grid = (pl.cdiv(C, c_t), pl.cdiv(HW, hw_t), N)

    extra = {}
    if donate_x:
        # Write the result into x's HBM buffer (caller must not reuse x).
        extra["input_output_aliases"] = {0: 0}

    out2 = pl.pallas_call(
        _add_pe_kernel,
        out_shape=jax.ShapeDtypeStruct((N, C, HW), x.dtype),
        grid=grid,
        in_specs=[
            # x: one batch element's (Ct, HWt) tile, batch dim squeezed away.
            pl.BlockSpec((pl.Squeezed(), c_t, hw_t), lambda c, s, n: (n, c, s)),
            # pe: same (c, s) tile for every batch index -> DMA skipped across
            # consecutive n steps (N is the innermost grid axis).
            pl.BlockSpec((pl.Squeezed(), c_t, hw_t), lambda c, s, n: (0, c, s)),
        ],
        out_specs=pl.BlockSpec((pl.Squeezed(), c_t, hw_t), lambda c, s, n: (n, c, s)),
        compiler_params=pltpu.CompilerParams(
            dimension_semantics=("parallel", "parallel", "parallel"),
            # 3 operands x 2 pipeline buffers x <=4 MiB tiles = <=24 MiB; set
            # the scoped limit explicitly (raises v5e's 16 MiB default, stays
            # well under v7x's 64 MiB physical VMEM).
            vmem_limit_bytes=32 << 20),
        **extra,
    )(x2, pe2)

    return out2.reshape(N, C, H, W)


if __name__ == "__main__":
    # Small shapes consistent with the module: N=2, d_model=8 (divisible by 4),
    # H=W=16; PE buffer built at a larger max_shape and sliced at init.
    N, d_model, H, W = 2, 8, 16, 16
    key = jax.random.PRNGKey(0)
    x = jax.random.normal(key, (N, d_model, H, W), dtype=jnp.float32)

    pe = make_pe(d_model, max_shape=(32, 32), temp_bug_fix=True)

    # Hot-path usage: prepare the PE view once, then call the kernel.
    pe2 = prepare_pe(pe, H, W, x.dtype)
    out = jax.block_until_ready(position_encoding_sine(x, pe2))

    # Reference (plain JAX) check of the forward-pass semantics.
    ref = x + pe[:, :, :H, :W]
    assert out.shape == x.shape and out.dtype == x.dtype
    assert jnp.allclose(out, ref, atol=1e-6, rtol=1e-6)

    # Also exercise the raw-buffer convenience path once.
    out2 = jax.block_until_ready(position_encoding_sine(x, pe))
    assert jnp.allclose(out2, ref, atol=1e-6, rtol=1e-6)

    print("KERNEL_OK")
</pallas_src>

<mosaic_0001>
module attributes {stable_mosaic.version = 11 : i64} {
  func.func @_add_pe_kernel(%arg0: i32, %arg1: i32, %arg2: i32, %arg3: memref<1x8x256xf32, #tpu.memory_space<vmem>>, %arg4: memref<1x8x256xf32, #tpu.memory_space<vmem>>, %arg5: memref<1x8x256xf32, #tpu.memory_space<vmem>>) attributes {dimension_semantics = [#tpu.dimension_semantics<parallel>, #tpu.dimension_semantics<parallel>, #tpu.dimension_semantics<parallel>], iteration_bounds = array<i64: 1, 1, 2>, scalar_prefetch = 0 : i64, scratch_operands = 0 : i64, tpu.core_type = #tpu.core_type<tc>, window_params = [{transform_indices = @transform_0, window_bounds = array<i64: 1, 8, 256>}, {transform_indices = @transform_1, window_bounds = array<i64: 1, 8, 256>}, {transform_indices = @transform_2, window_bounds = array<i64: 1, 8, 256>}]} {
    %c0 = arith.constant 0 : index
    %c0_0 = arith.constant 0 : index
    %c0_1 = arith.constant 0 : index
    %0 = vector.load %arg3[%c0, %c0_0, %c0_1] : memref<1x8x256xf32, #tpu.memory_space<vmem>>, vector<1x8x256xf32>
    %1 = vector.shape_cast %0 : vector<1x8x256xf32> to vector<8x256xf32>
    %c0_2 = arith.constant 0 : index
    %c0_3 = arith.constant 0 : index
    %c0_4 = arith.constant 0 : index
    %2 = vector.load %arg4[%c0_2, %c0_3, %c0_4] : memref<1x8x256xf32, #tpu.memory_space<vmem>>, vector<1x8x256xf32>
    %3 = vector.shape_cast %2 : vector<1x8x256xf32> to vector<8x256xf32>
    %4 = arith.addf %1, %3 : vector<8x256xf32>
    %c0_5 = arith.constant 0 : index
    %c0_6 = arith.constant 0 : index
    %c0_7 = arith.constant 0 : index
    %5 = vector.load %arg5[%c0_5, %c0_6, %c0_7] : memref<1x8x256xf32, #tpu.memory_space<vmem>>, vector<1x8x256xf32>
    %6 = vector.shape_cast %5 : vector<1x8x256xf32> to vector<8x256xf32>
    %7 = vector.shape_cast %4 : vector<8x256xf32> to vector<1x8x256xf32>
    tpu.vector_store %arg5[%c0_5, %c0_6, %c0_7], %7 {strides = array<i32>} : memref<1x8x256xf32, #tpu.memory_space<vmem>>, vector<1x8x256xf32>,
    return
  }
  func.func @transform_0(%arg0: i32, %arg1: i32, %arg2: i32) -> (i32, i32, i32) {
    %c0_i32 = arith.constant 0 : i32
    return %arg2, %arg0, %arg1 : i32, i32, i32
  }
  func.func @transform_1(%arg0: i32, %arg1: i32, %arg2: i32) -> (i32, i32, i32) {
    %c0_i32 = arith.constant 0 : i32
    %c0_i32_0 = arith.constant 0 : i32
    return %c0_i32, %arg0, %arg1 : i32, i32, i32
  }
  func.func @transform_2(%arg0: i32, %arg1: i32, %arg2: i32) -> (i32, i32, i32) {
    %c0_i32 = arith.constant 0 : i32
    return %arg2, %arg0, %arg1 : i32, i32, i32
  }
}

</mosaic_0001>

<bundles_post_ra>
// kernel: tpu_custom_call.1
= control target key start
LH: loop header
LB: loop body
LE: loop exit
PB: predicated region body
PF: predicated region fallthrough
CT: control target
= control target key end

     0   :  { %7 = vsyncpa [#allocation3], 0  ;;  %s763_s0 = inlined_call_operand.hbm [shape: f32[2,8,256], index: 0, kind: input, shape index: {}]   ;;  %s764_s1 = inlined_call_operand.hbm [shape: f32[1,8,256], index: 1, kind: input, shape index: {}]   ;;  %s765_s2 = inlined_call_operand.hbm [shape: f32[2,8,256], index: 2, kind: output, shape index: {}]  }
   0x1   :  { %9 = vsyncpa [#allocation3 + $0x1], 0 }
   0x2   :  { %10 = vsyncpa [#allocation6], 0 }
   0x3   :  { %11 = vsyncpa [#allocation4], 0 }
   0x4   :  { %13 = vsyncpa [#allocation4 + $0x1], 0  ;;  %s614_s9 = smov 0   ;;  %s616_s10 = smov 0  }
   0x5   :  { %s618_s11 = smov 0   ;;  %s620_s12 = smov 0  }
   0x6   :  { %s622_s13 = smov 0   ;;  %s624_s14 = smov 0  }
   0x7 LB: > { %s358_s15 = sadd.s32 4294967295, %s596_s14   ;;  %s359_s16 = sadd.s32 4294967294, %s596_s14   ;;  %s596_s14 = sphi %s624_s14, %s19_s14   ;;  %s592_s13 = sphi %s622_s13, %s777_s13   ;;  %s588_s12 = sphi %s620_s12, %s776_s12   ;;  %s584_s11 = sphi %s618_s11, %s775_s11   ;;  %s580_s10 = sphi %s616_s10, %s774_s10   ;;  %s576_s9 = sphi %s614_s9, %s773_s9  }
   0x8   : > { %p62_p0 = scmp.ne.s32.totalorder %s580_s10, %s576_s9  ;;  %p648_p1 = scmp.eq.s32.totalorder %s358_s15, 0 }
   0x9   : > { %p652_p2 = scmp.eq.s32.totalorder %s358_s15, 1  ;;  %p124_p3 = scmp.eq.s32.totalorder %s359_s16, 1 }
   0xa   : > { %p658_p4 = por %p648_p1, %p62_p0  ;;  %p360_p5 = scmp.ge.s32.totalorder %s596_s14, 1 }
   0xb   : > { %p663_p6 = por %p124_p3, %p62_p0  ;;  %p131_p7 = scmp.lt.s32.totalorder %s596_s14, 3 }
   0xc   : > { %s148_s23 = sshll.u32 %s764_s1, 4  ;;  %p362_p9 = scmp.ge.s32.totalorder %s596_s14, 2  ;;  %s149_s23 = int_to_ptr.hbm [resolvable:$true] %s148_s23 }
   0xd   : > { %p671_p8 = pnand %p360_p5, %p131_p7  ;;  %s598_s25 = smov [#allocation5]  }
   0xe   : > { %s150_s26 = sshll.u32 %s598_s25, 4  ;;  %s31_s27 = sadd.s32 1, %s592_s13  ;;  %s151_s26 = int_to_ptr.vmem [resolvable:$true] %s150_s26 }
   0xf   : > { %p385_p10 = pneg %p671_p8  ;;  %p32_p12 = scmp.ge.s32.totalorder %s31_s27, 2 }
  0x10   : > { %s49_s28 = sadd.s32 1, %s584_s11  ;;  %p56_p13 = scmp.ne.s32.totalorder %s584_s11, %s580_s10 }
  0x11   : > { %p386_p11 = pnand %p385_p10, %p648_p1  ;;  %p57_p0 = scmp.eq.s32.totalorder %s596_s14, 0 }
  0x12   : > { %s779_s27 = smov (%p32_p12, %s31_s27), 0  ;;  %p693_p5 = por %p652_p2, %p56_p13 }
  0x13   : > { %388 = dma.hbm_to_vmem [thread:$0]  (!%p386_p11), %s149_s23, 256, %s151_s26, [#allocation6]  }
  0x14   : > { %p687_p3 = por %p57_p0, %p56_p13  ;;  %s42_s3 = ssub.s32 %s592_s13, %s779_s27 }
  0x15   : > { %p398_p7 = scmp.lt.s32.totalorder %s596_s14, 2  ;;  %p47_p10 = scmp.eq.s32.totalorder %s42_s3, 0 }
  0x16   : > { %s161_s4 = sand.u32 1, %s584_s11   ;;  %s375_s7 = sshll.u32 %s592_s13, 4 }
  0x17   : > { %s363_s5 = sshll.u32 %s161_s4, 4  ;;  %s174_s16 = scalar_lea.hbm %s763_s0, %s375_s7 }
  0x18   : > { %s702_s6 = scalar_select %p47_p10, %s584_s11, %s49_s28  }
  0x19   : > { %s165_s21 = scalar_lea.vmem [#allocation2], %s363_s5  ;;  %s176_s18 = sshll.u32 %s174_s16, 4  ;;  %s177_s18 = int_to_ptr.hbm [resolvable:$true] %s176_s18 }
  0x1a   : > { %s178_s22 = sshll.u32 %s165_s21, 4  ;;  %p390_p2 = pnand %p398_p7, %p687_p3  ;;  %s179_s22 = int_to_ptr.vmem [resolvable:$true] %s178_s22 }
  0x1b   : > { %s162_s23 = scalar_lea.sflag [#allocation3], %s161_s4  ;;  %187 = sbr.rel (%p671_p8) target bundleno = 50 (0x32), region = 28 }
  0x1c   : > { %392 = dma.hbm_to_vmem [thread:$0]  (!%p390_p2), %s177_s18, 256, %s179_s22, %s162_s23  }
  0x1d   : > { %s713_s25 = sand.u32 (!%p671_p8), 1, %s580_s10  }
  0x1e   : > { %s367_s26 = sshll.u32 (!%p671_p8), %s713_s25, 4  ;;  %s190_s28 = scalar_lea.sflag (!%p671_p8), [#allocation3], %s713_s25 }
  0x1f   : > { %s193_s3 = scalar_lea.vmem (!%p671_p8), [#allocation2], %s367_s26 }
  0x20   : > { %563 = dma.done.wait (%p658_p4), %s190_s28, 256  }
  0x21   : > { %565 = vsyncadd (%p658_p4), %s190_s28, 4294967040 }
  0x22   : > { %567 = dma.done.wait (%p648_p1), [#allocation6], 256  }
  0x23   : > { %569 = vsyncadd (%p648_p1), [#allocation6], 4294967040  ;;  %s376_s24 = sshll.u32 %s588_s12, 4  ;;  %s219_s7 = scalar_lea.vmem [#allocation7], %s367_s26  ;;  %v223_v0 = vld [vmem:[%s193_s3] sm:$0xff]  ;;  %v224_v2 = vld [vmem:[%s193_s3 + $0x8] sm:$0xff] }
  0x24   : > { %s247_s5 = scalar_lea.hbm %s765_s2, %s376_s24  ;;  %s249_s8 = sshll.u32 %s219_s7, 4  ;;  %v225_v1 = vld [vmem:[#allocation5] sm:$0xff]  ;;  %v226_v4 = vld [vmem:[#allocation5 + $0x8] sm:$0xff]  ;;  %s250_s8 = int_to_ptr.vmem [resolvable:$true] %s249_s8 }
  0x25   : > { %s251_s15 = sshll.u32 %s247_s5, 4  ;;  %v227_v3 = vadd.f32 %v225_v1, %v223_v0  ;;  %v228_v5 = vadd.f32 %v226_v4, %v224_v2  ;;  %s232_s17 = scalar_lea.sflag [#allocation4], %s713_s25  ;;  %s252_s15 = int_to_ptr.hbm [resolvable:$true] %s251_s15 }
  0x26   : > { %s524_s12 = sshra.s32 %s252_s15, 4  ;;  %s530_s22 = scalar_lea.hbm %s765_s2, 32  ;;  %s525_s12 = int_to_ptr.hbm [resolvable:$true] %s524_s12 }
  0x27   : > { %229 = vst [vmem:[%s219_s7] sm:$0xff] %v227_v3  ;;  %s526_s19 = scalar_lea.hbm %s525_s12, 16  ;;  %p531_p11 = scmp.lt.s32.totalorder %s525_s12, %s765_s2 }
  0x28   : > { %230 = vst [vmem:[%s219_s7 + $0x8] sm:$0xff] %v228_v5  ;;  %p527_p1 = scmp.ne.s32.totalorder %s525_s12, %s526_s19  ;;  %p532_p12 = scmp.lt.s32.totalorder %s530_s22, %s526_s19 }
  0x2a   : > { %p528_p4 = pnand %p527_p1, %p693_p5  ;;  %p533_p13 = por %p532_p12, %p531_p11 }
  0x2c   : > { %p529_p8 = pneg %p528_p4 }
  0x2e   : > { %p534_p0 = pnand %p533_p13, %p529_p8 }
  0x30   : > { %537 = shalt.err (!%p534_p0)
}
  0x31   : > { %383 = dma.vmem_to_hbm [thread:$0]  (%p693_p5), %s250_s8, 256, %s252_s15, %s232_s17  }
  0x32 PF: > { %s263_s25 = sand.u32 1, %s576_s9   ;;  %p394_p3 = pnand %p362_p9, %p663_p6 }
  0x33   : > { %s264_s26 = scalar_lea.sflag [#allocation4], %s263_s25 }
  0x34   : > { %p395_p7 = pneg %p394_p3 }
  0x36   : > { %571 = dma.done.wait (%p395_p7), %s264_s26, 256  }
  0x37   : > { %573 = vsyncadd (%p395_p7), %s264_s26, 4294967040  ;;  %s19_s14 = sadd.s32 1, %s596_s14   ;;  %s773_s9 = smov %s580_s10 }
  0x38   : > { %p16_p10 = scmp.ge.s32.totalorder %s19_s14, 4   ;;  %s774_s10 = smov %s584_s11 }
  0x39   : > { %s775_s11 = smov %s702_s6  ;;  %s776_s12 = smov %s592_s13 }
  0x3a   : > { %s777_s13 = smov %s779_s27  ;;  %18 = sbr.rel (!%p16_p10) target bundleno = 7 (0x7), region = 78 }
  0x3f   :  { %270 = vsyncpa [#allocation3], 1 }
  0x40   :  { %272 = vsyncpa [#allocation3 + $0x1], 1 }
  0x41   :  { %273 = vsyncpa [#allocation6], 1 }
  0x42   :  { %274 = vsyncpa [#allocation4], 1 }
  0x43   :  { %276 = vsyncpa [#allocation4 + $0x1], 1 }

</bundles_post_ra>
